<compile_context>
chip_gen: v5e
topology: v5e:2x2
jax: 0.10.0
libtpu: 0.0.40
codegen_flags: <defaults>
</compile_context>

<pallas_src>
import functools

import jax
import jax.numpy as jnp
from jax.experimental import pallas as pl
from jax.experimental.pallas import tpu as pltpu


def _cdiv(a, b):
    return (a + b - 1) // b


def _round_up(x, m):
    return ((x + m - 1) // m) * m


def _entropy_kernel(x_ref, o_ref, *, total_n, tiles_per_core, tile_rows,
                    needs_mask):
    c = pl.program_id(0)   # core / parallel axis
    i = pl.program_id(1)   # streaming / arbitrary axis

    @pl.when(i == 0)
    def _init():
        o_ref[...] = jnp.zeros_like(o_ref)

    x = x_ref[...].astype(jnp.float32)                 # (tile_rows, C)

    # Numerically-stable softmax statistics over the class (lane) axis.
    m = jnp.max(x, axis=-1, keepdims=True)             # (tile_rows, 1)
    xm = x - m
    e = jnp.exp(xm)                                    # one exp / element
    s = jnp.sum(e, axis=-1, keepdims=True)
    t = jnp.sum(e * xm, axis=-1, keepdims=True)
    # TODO(synk): if a bundle dump shows the XLU reduce slot binding before
    # HBM/EUP, move these two lane sums onto the idle MXU via jnp.dot(e, ones).

    # Fused entropy: H_row = log(s) - sum(e*(x-m))/s  ==  -sum(p * log p).
    # Keep the exact reciprocal: the approx path can breach 1e-5 tolerance.
    ent = jnp.log(s) - t * pl.reciprocal(s, approx=False)   # (tile_rows, 1)

    if needs_mask:
        g = c * tiles_per_core + i     # logical (unclamped) global tile index

        @pl.when((g + 1) * tile_rows <= total_n)
        def _full_tile():
            o_ref[...] += jnp.sum(ent).reshape(1, 1)

        @pl.when((g + 1) * tile_rows > total_n)
        def _partial_tile():
            row_ids = g * tile_rows + jax.lax.broadcasted_iota(
                jnp.int32, ent.shape, 0)
            # Select (not multiply): padded rows may hold Inf/NaN garbage.
            o_ref[...] += jnp.sum(
                jnp.where(row_ids < total_n, ent, 0.0)).reshape(1, 1)
    else:
        o_ref[...] += jnp.sum(ent).reshape(1, 1)


def _default_block_bytes():
    # Bigger tiles amortize the ~0.35us per-grid-step overhead.  v7x (3.2 TB/s
    # HBM, identified by its 64 MiB per-TC VMEM) wants the largest tiles.
    try:
        if pltpu.get_tpu_info().vmem_capacity_bytes <= (64 << 20):
            return 6 << 20        # v7x-class
    except Exception:
        pass
    return 4 << 20                # v5e / v6e (128 MiB VMEM) and fallback


def entropy(x, *, block_bytes=None, num_cores=2):
    """x: (N, C) float array -> scalar entropy loss (float32).

    Softmax over dim=1 (the class/lane axis), matching nn.Softmax() on a 2-D
    input.  The class axis is kept as one full lane-dense block.
    """
    assert x.ndim == 2, "kernel implements the 2-D (N, C) case; softmax over dim=1"
    N, C = x.shape
    itemsize = jnp.dtype(x.dtype).itemsize
    if block_bytes is None:
        block_bytes = _default_block_bytes()

    # dtype-native sublane packing: 8 rows for 32-bit, 16 for 16-bit, 32 for
    # 8-bit dtypes.
    sublane = {4: 8, 2: 16, 1: 32}.get(itemsize, 8)

    # Rows per tile from the requested HBM block size in the INPUT dtype.
    tn = max(sublane, (block_bytes // (C * itemsize)) // sublane * sublane)
    tn = min(tn, _round_up(N, sublane))

    # VMEM footprint: double-buffered input tile + ~3 tile-sized f32
    # temporaries (upcast x, xm, e) materialized for the two lane reductions.
    def _vmem_need(rows):
        return 2 * rows * C * itemsize + 3 * rows * C * 4 + (2 << 20)

    VMEM_CAP = 44 << 20            # stay well under v7x's 64 MiB physical VMEM
    while tn > sublane and _vmem_need(tn) > VMEM_CAP:
        tn = max(sublane, (tn // 2) // sublane * sublane)
    # TODO(synk): for very large C where even tn == sublane overshoots VMEM,
    # add an online-softmax C-tiled path instead of relying on a larger limit.

    num_tiles = _cdiv(N, tn)
    cores = num_cores if num_tiles >= 2 else 1
    tiles_per_core = _cdiv(num_tiles, cores)
    needs_mask = (N % tn != 0) or (cores * tiles_per_core != num_tiles)

    def x_index_map(c, i):
        g = c * tiles_per_core + i
        # Clamp over-subscribed steps (odd tile count split across cores) to a
        # valid block; their rows are fully masked out inside the kernel.
        return (jnp.minimum(g, num_tiles - 1), 0)

    kernel = functools.partial(
        _entropy_kernel, total_n=N, tiles_per_core=tiles_per_core,
        tile_rows=tn, needs_mask=needs_mask)

    vmem_limit = int(min(max(_vmem_need(tn) + (4 << 20), 32 << 20), 56 << 20))

    partials = pl.pallas_call(
        kernel,
        out_shape=jax.ShapeDtypeStruct((cores, 1), jnp.float32),
        grid_spec=pltpu.PrefetchScalarGridSpec(
            num_scalar_prefetch=0,
            grid=(cores, tiles_per_core),
            in_specs=[pl.BlockSpec((tn, C), x_index_map)],
            out_specs=pl.BlockSpec((1, 1), lambda c, i: (c, 0)),
        ),
        compiler_params=pltpu.CompilerParams(
            dimension_semantics=("parallel", "arbitrary"),
            vmem_limit_bytes=vmem_limit),
        cost_estimate=pl.CostEstimate(
            flops=5 * N * C,
            transcendentals=N * C,
            bytes_accessed=N * C * itemsize + cores * 4),
    )(x)

    # Mean over the TOTAL batch; per-core partial sums are combined here.
    return jnp.sum(partials) * (1.0 / N)


if __name__ == "__main__":
    def ref_entropy(x):
        p = jax.nn.softmax(x.astype(jnp.float32), axis=1)
        return jnp.mean(jnp.sum(-p * jnp.log(p), axis=1), axis=0)

    # Small shape consistent with the module: batch=8, classes=128.
    x = jax.random.normal(jax.random.PRNGKey(0), (8, 128), dtype=jnp.float32)
    loss = entropy(x)
    jax.block_until_ready(loss)
    assert jnp.allclose(loss, ref_entropy(x), atol=1e-5, rtol=1e-5), (
        loss, ref_entropy(x))

    # Batch not a multiple of the sublane tile -> partial-tile mask path.
    x2 = jax.random.normal(jax.random.PRNGKey(1), (20, 128), dtype=jnp.float32)
    loss2 = entropy(x2)
    jax.block_until_ready(loss2)
    assert jnp.allclose(loss2, ref_entropy(x2), atol=1e-5, rtol=1e-5), (
        loss2, ref_entropy(x2))

    # Tiny block -> multiple tiles -> exercises the 2-core grid split, the
    # clamped over-subscribed tile and the per-core partial-sum combine.
    loss3 = entropy(x2, block_bytes=8 * 128 * 4)
    jax.block_until_ready(loss3)
    assert jnp.allclose(loss3, ref_entropy(x2), atol=1e-5, rtol=1e-5), (
        loss3, ref_entropy(x2))

    # bf16 input -> dtype-aware tile sizing (16-row sublane packing).
    x4 = x2.astype(jnp.bfloat16)
    loss4 = entropy(x4)
    jax.block_until_ready(loss4)
    assert jnp.allclose(loss4, ref_entropy(x4), atol=1e-4, rtol=1e-4), (
        loss4, ref_entropy(x4))

    print("KERNEL_OK")
</pallas_src>

<mosaic_0001>
module attributes {stable_mosaic.version = 11 : i64} {
  func.func @_entropy_kernel(%arg0: i32, %arg1: i32, %arg2: memref<8x128xf32, #tpu.memory_space<vmem>>, %arg3: memref<1x1xf32, #tpu.memory_space<vmem>>) attributes {dimension_semantics = [#tpu.dimension_semantics<parallel>, #tpu.dimension_semantics<arbitrary>], iteration_bounds = array<i64: 1, 1>, scalar_prefetch = 0 : i64, scratch_operands = 0 : i64, tpu.core_type = #tpu.core_type<tc>, window_params = [{transform_indices = @transform_0, window_bounds = array<i64: 8, 128>}, {transform_indices = @transform_1, window_bounds = array<i64: 1, 1>}]} {
    %c0_i32 = arith.constant 0 : i32
    %0 = arith.cmpi eq, %arg1, %c0_i32 : i32
    %1 = arith.extui %0 : i1 to i32
    %c0_i32_0 = arith.constant 0 : i32
    %2 = arith.cmpi ne, %1, %c0_i32_0 : i32
    scf.if %2 {
      %cst_9 = arith.constant 0.000000e+00 : f32
      %26 = vector.broadcast %cst_9 : f32 to vector<1x1xf32>
      %c0_10 = arith.constant 0 : index
      %c0_11 = arith.constant 0 : index
      %27 = vector.load %arg3[%c0_10, %c0_11] : memref<1x1xf32, #tpu.memory_space<vmem>>, vector<1x1xf32>
      tpu.vector_store %arg3[%c0_10, %c0_11], %26 {strides = array<i32>} : memref<1x1xf32, #tpu.memory_space<vmem>>, vector<1x1xf32>,
    } else {
    }
    %c0 = arith.constant 0 : index
    %c0_1 = arith.constant 0 : index
    %3 = vector.load %arg2[%c0, %c0_1] : memref<8x128xf32, #tpu.memory_space<vmem>>, vector<8x128xf32>
    %cst = arith.constant dense<0xFF800000> : vector<8xf32>
    %4 = vector.multi_reduction <maximumf>, %3, %cst [1] : vector<8x128xf32> to vector<8xf32>
    %5 = vector.shape_cast %4 : vector<8xf32> to vector<8x1xf32>
    %6 = vector.broadcast %5 : vector<8x1xf32> to vector<8x128xf32>
    %7 = arith.subf %3, %6 : vector<8x128xf32>
    %8 = math.exp %7 : vector<8x128xf32>
    %cst_2 = arith.constant dense<0.000000e+00> : vector<8xf32>
    %9 = vector.multi_reduction <add>, %8, %cst_2 [1] : vector<8x128xf32> to vector<8xf32>
    %10 = vector.shape_cast %9 : vector<8xf32> to vector<8x1xf32>
    %11 = arith.mulf %8, %7 : vector<8x128xf32>
    %cst_3 = arith.constant dense<0.000000e+00> : vector<8xf32>
    %12 = vector.multi_reduction <add>, %11, %cst_3 [1] : vector<8x128xf32> to vector<8xf32>
    %13 = vector.shape_cast %12 : vector<8xf32> to vector<8x1xf32>
    %14 = math.log %10 : vector<8x1xf32>
    %15 = tpu.reciprocal %10 : vector<8x1xf32> -> vector<8x1xf32>
    %16 = arith.mulf %13, %15 : vector<8x1xf32>
    %17 = arith.subf %14, %16 : vector<8x1xf32>
    %c0_4 = arith.constant 0 : index
    %c0_5 = arith.constant 0 : index
    %18 = vector.load %arg3[%c0_4, %c0_5] : memref<1x1xf32, #tpu.memory_space<vmem>>, vector<1x1xf32>
    %19 = vector.shape_cast %17 : vector<8x1xf32> to vector<1x8x1xf32>
    %cst_6 = arith.constant dense<0.000000e+00> : vector<1xf32>
    %20 = vector.multi_reduction <add>, %19, %cst_6 [1, 2] : vector<1x8x1xf32> to vector<1xf32>
    %21 = vector.shape_cast %20 : vector<1xf32> to vector<1x1x1xf32>
    %22 = vector.extract %21[0, 0, 0] : f32 from vector<1x1x1xf32>
    %23 = vector.broadcast %22 : f32 to vector<1x1xf32>
    %24 = arith.addf %18, %23 : vector<1x1xf32>
    %c0_7 = arith.constant 0 : index
    %c0_8 = arith.constant 0 : index
    %25 = vector.load %arg3[%c0_7, %c0_8] : memref<1x1xf32, #tpu.memory_space<vmem>>, vector<1x1xf32>
    tpu.vector_store %arg3[%c0_7, %c0_8], %24 {strides = array<i32>} : memref<1x1xf32, #tpu.memory_space<vmem>>, vector<1x1xf32>,
    return
  }
  func.func @transform_0(%arg0: i32, %arg1: i32) -> (i32, i32) {
    %c1_i32 = arith.constant 1 : i32
    %0 = arith.muli %arg0, %c1_i32 : i32
    %1 = arith.addi %0, %arg1 : i32
    %c0_i32 = arith.constant 0 : i32
    %2 = arith.minsi %1, %c0_i32 : i32
    %c0_i32_0 = arith.constant 0 : i32
    %c0_i32_1 = arith.constant 0 : i32
    return %2, %c0_i32_0 : i32, i32
  }
  func.func @transform_1(%arg0: i32, %arg1: i32) -> (i32, i32) {
    %c0_i32 = arith.constant 0 : i32
    %c0_i32_0 = arith.constant 0 : i32
    return %arg0, %c0_i32 : i32, i32
  }
}

</mosaic_0001>

<bundles_post_ra>
// kernel: tpu_custom_call.1
= control target key start
LH: loop header
LB: loop body
LE: loop exit
PB: predicated region body
PF: predicated region fallthrough
CT: control target
= control target key end

     0   :  { %6 = vsyncpa [#allocation3], 0  ;;  %s185_s0 = inlined_call_operand.hbm [shape: f32[8,128], index: 0, kind: input, shape index: {}]   ;;  %s186_s1 = inlined_call_operand.hbm [shape: f32[1,1], index: 1, kind: output, shape index: {}]  }
   0x1   :  { %7 = vsyncpa [#allocation4], 0  ;;  %s18_s8 = sshll.u32 %s185_s0, 4  ;;  %s164_s9 = smov [#allocation2]   ;;  %s19_s8 = int_to_ptr.hbm [resolvable:$true] %s18_s8 }
   0x2   :  { %s20_s10 = sshll.u32 %s164_s9, 4  ;;  %s21_s10 = int_to_ptr.vmem [resolvable:$true] %s20_s10 }
   0x3   :  { %23 = dma.hbm_to_vmem [thread:$0]  %s19_s8, 128, %s21_s10, [#allocation3]  }
   0x4   :  { %160 = dma.done.wait [#allocation3], 128  }
   0x5   :  { %161 = vsyncadd [#allocation3], 4294967168  ;;  %vm35_vm0 = vcmask 0   ;;  %v165_v0 = vmov 0.0   ;;  %v37_v1 = vld [vmem:[#allocation2] sm:$0xff]  ;;  %vm67_vm5 = vcmask 7168  }
   0x6   :  { %36 = vst.msk [vmem:[#allocation5] sm:$0x1] %vm35_vm0, %v165_v0  ;;  %38 = vmax.xlane.f32.xlu0 %v37_v1  ;;  %s166_s0 = smov [#allocation5]   ;;  %s89_s14 = sshll.u32 %s186_s1, 4  ;;  %s90_s14 = int_to_ptr.hbm [resolvable:$true] %s89_s14 }
   0x7   :  { %s87_s11 = sshll.u32 %s166_s0, 4  ;;  %s88_s11 = int_to_ptr.vmem [resolvable:$true] %s87_s11 }
   0xd   :  { %v66_v31 = vld [vmem:[#allocation5] sm:$0x1] }
  0x79   :  { %v39_v2 = vpop.xlane.xlu0 %38 }
  0x7a   :  { %v40_v3 = vsub.f32 %v37_v1, %v39_v2 }
  0x7c   :  { %v41_v4 = vmul.f32 1.442695, %v40_v3 }
  0x7e   :  { %106 = vpow2.f32 %v41_v4 }
  0x84   :  { %v107_v5 = vpop.eup %106 }
  0x85   :  { %43 = vadd.xlane.f32.xlu0 %v107_v5  ;;  %v45_v6 = vmul.f32 %v107_v5, %v40_v3 }
  0x87   :  { %46 = vadd.xlane.f32.xlu1 %v45_v6 }
  0xf8   :  { %v44_v7 = vpop.xlane.xlu0 %43 }
  0xf9   :  { %108 = vrcp.f32 %v44_v7  ;;  %v61_v11 = vand.u32 2147483648, %v44_v7  ;;  %v59_v13 = vand.u32 2147483647, %v44_v7  ;;  %vm55_vm2 = vweird.f32 %v44_v7 }
  0xfa   :  { %110 = vlog2.f32 %v44_v7  ;;  %v47_v19 = vpop.xlane.xlu1 %46 }
  0xfb   :  { %v62_v16 = vor.u32 1.1754944e-38, %v61_v11  ;;  %vm60_vm4 = vcmp.eq.f32.partialorder %v59_v13, 8.507059e+37 }
  0xff   :  { %v109_v8 = vpop.eup %108 }
 0x100   :  { %v51_v9 = vmul.f32 %v109_v8, %v44_v7  ;;  %vm56_vm1 = vweird.f32 %v109_v8  ;;  %v111_v15 = vpop.eup %110 }
 0x101   :  { %vm57_vm3 = vmor %vm55_vm2, %vm56_vm1  ;;  %v49_v21 = vmul.f32 0.6931472, %v111_v15 }
 0x102   :  { %v52_v10 = vsub.f32 1.0, %v51_v9 }
 0x104   :  { %v53_v12 = vmul.f32 %v109_v8, %v52_v10 }
 0x106   :  { %v54_v14 = vadd.f32 %v109_v8, %v53_v12 }
 0x108   :  { %v58_v17 = vsel %vm57_vm3, %v109_v8, %v54_v14 }
 0x109   :  { %v63_v18 = vsel %vm60_vm4, %v62_v16, %v58_v17 }
 0x10a   :  { %v64_v20 = vmul.f32 %v63_v18, %v47_v19 }
 0x10c   :  { %v65_v22 = vsub.f32 %v49_v21, %v64_v20 }
 0x10e   :  { %v68_v23 = vsel %vm67_vm5, %v65_v22, 0.0 }
 0x10f   :  { %69 = vadd.xlane.f32.xlu1 %v68_v23 }
 0x182   :  { %v70_v24 = vpop.xlane.xlu1 %69 }
 0x183   :  { %v71_v25 = vrot.slane %v70_v24, 4 }
 0x185   :  { %v72_v26 = vadd.f32 %v71_v25, %v70_v24 }
 0x187   :  { %v73_v27 = vrot.slane %v72_v26, 2 }
 0x189   :  { %v74_v28 = vadd.f32 %v73_v27, %v72_v26 }
 0x18b   :  { %v75_v29 = vrot.slane %v74_v28, 1 }
 0x18d   :  { %v76_v30 = vadd.f32 %v75_v29, %v74_v28 }
 0x18f   :  { %101 = vpush %v76_v30 }
 0x1c0   :  { %s102_s15 = spop %101 }
 0x1c1   :  { %v78_v32 = vstv %s102_s15 }
 0x1c2   :  { %v79_v33 = vadd.f32 %v78_v32, %v66_v31 }
 0x1c4   :  { %81 = vst.msk [vmem:[#allocation5] sm:$0x1] %vm35_vm0, %v79_v33 }
 0x1c5   :  { %92 = dma.vmem_to_hbm [thread:$0]  %s88_s11, 16, %s90_s14, [#allocation4]  }
 0x1c6   :  { %162 = dma.done.wait [#allocation4], 16  }
 0x1c7   :  { %163 = vsyncadd [#allocation4], 4294967280 }
 0x1c8   :  { %97 = vsyncpa [#allocation3], 1 }
 0x1c9   :  { %98 = vsyncpa [#allocation4], 1 }

</bundles_post_ra>
